<compile_context>
chip_gen: v7x
topology: tpu7x:2x2x1
jax: 0.10.0
libtpu: 0.0.40
codegen_flags: <defaults>
</compile_context>

<pallas_src>
import jax
import jax.numpy as jnp
from jax.experimental import pallas as pl
from jax.experimental.pallas import tpu as pltpu


def _round_up(x, m):
    return ((x + m - 1) // m) * m


# --------------------------------------------------------------------------
# Fused conv + activation + maxpool Pallas kernel (factory closes over statics)
# --------------------------------------------------------------------------

def _make_fused_kernel(*, packed, k, s, ps, pk, pp, Tp, Tc_a, Th_a, Lc, C,
                       b_top, need_low, need_top, activation):
    step = Tp * ps * s          # input-row offset (in padded-input rows) between bands

    def epilogue(acc, acc_ref, o_ref, b):
        # acc: (Tc_a, C) f32 conv band (rows >= Tc are never read by the pool).
        if activation is not None:                       # Identity by default
            acc = activation(acc)
        acc_ref[...] = acc

        # -inf mask for conv rows outside [0, Lc): pool padding (band 0) and the
        # last-band overhang only -> gate with pl.when so interior bands skip it.
        if need_low or need_top:
            conds = []
            if need_top:
                conds.append(b >= b_top)
            if need_low:
                conds.append(b == 0)
            cond = conds[0]
            for c in conds[1:]:
                cond = jnp.logical_or(cond, c)

            @pl.when(cond)
            def _():
                c0 = b * (Tp * ps) - pp                  # first conv row of the band
                row = jax.lax.broadcasted_iota(jnp.int32, (Tc_a, 1), 0) + c0
                valid = jnp.logical_and(row >= 0, row < Lc)
                acc_ref[...] = jnp.where(valid, acc_ref[...], -jnp.inf)

        # ---- 1-D max-pool: max over pk strided slices of the conv band ----
        def window(j):
            if ps == 1:
                return acc_ref[pl.ds(j, Tp), :]
            return acc_ref[pl.ds(j, Tp, stride=ps), :]

        pooled = window(0)
        for j in range(1, pk):
            pooled = jnp.maximum(pooled, window(j))
        o_ref[...] = pooled.astype(o_ref.dtype)

    if packed:
        # conv stride 1: one (Th_a, E) @ (E, k*C) bf16 dot, then k sublane-shifted adds.
        def kernel(x_ref, w_ref, o_ref, y_ref, acc_ref):
            # x_ref : (Lx2, E) bf16 zero-padded, shifted input sequence (resident)
            # w_ref : (E, k*C) bf16 packed per-tap weights (resident)
            # o_ref : (Tp, C)  pooled output band
            # y_ref : (Th_a, k*C) f32 per-tap conv scratch
            # acc_ref: (Tc_a, C) f32 conv band scratch
            b = pl.program_id(1)
            base = pl.multiple_of(b * step, 8)

            xh = x_ref[pl.ds(base, Th_a), :]
            y_ref[...] = jnp.dot(xh, w_ref[...], preferred_element_type=jnp.float32)

            acc = y_ref[0:Tc_a, 0:C]
            for dy in range(1, k):                       # k is small & static
                acc = acc + y_ref[dy:dy + Tc_a, dy * C:(dy + 1) * C]
            epilogue(acc, acc_ref, o_ref, b)
    else:
        # conv stride > 1: k accumulating bf16 MXU dots over strided slices.
        # TODO(synk): for s > 1, phase-split x into s planes so tap loads are dense.
        def kernel(x_ref, w_ref, o_ref, acc_ref):
            b = pl.program_id(1)
            base = pl.multiple_of(b * step, 8)

            acc = jnp.zeros((Tc_a, C), jnp.float32)
            for dy in range(k):
                if s == 1:
                    xs = x_ref[pl.ds(base + dy, Tc_a), :]
                else:
                    xs = x_ref[pl.ds(base + dy, Tc_a, stride=s), :]
                acc = acc + jnp.dot(xs, w_ref[dy], preferred_element_type=jnp.float32)
            epilogue(acc, acc_ref, o_ref, b)

    return kernel


# --------------------------------------------------------------------------
# pallas_call wrapper
# --------------------------------------------------------------------------

def text_tokenizer_forward(x, w, *, kernel_size, stride, padding,
                           pooling_kernel_size=3, pooling_stride=2, pooling_padding=1,
                           max_pool=True, activation=None, band_rows=512):
    """x: (N, L, E) float32.  w: PyTorch Conv2d weight (C, 1, k, E).  Returns (N, Lp, C)."""
    N, L, E = x.shape
    C, _, k, Ew = w.shape
    assert Ew == E and k == kernel_size
    s, p = stride, padding
    if max_pool:
        pk, ps, pp = pooling_kernel_size, pooling_stride, pooling_padding
    else:
        pk, ps, pp = 1, 1, 0

    Lc = (L + 2 * p - k) // s + 1                  # conv output length (seq)
    Lp = (Lc + 2 * pp - pk) // ps + 1              # pooled output length (seq)

    # Band of pooled rows per grid step: multiple of 8 sublanes, capped for VMEM.
    Tp = min(_round_up(band_rows, 8), _round_up(Lp, 8))
    nb = pl.cdiv(Lp, Tp)
    Lp_pad = nb * Tp
    Tc = (Tp - 1) * ps + pk                        # conv rows read by the pool per band
    Tc_a = _round_up(Tc, 8)                        # 8-aligned conv band (MXU M dim)
    Th_a = _round_up((Tc_a - 1) * s + k, 8)        # input halo rows per band (dense)
    step = Tp * ps * s

    # Which bands can read conv rows outside [0, Lc)?  Only those need -inf masking.
    need_low = pp > 0                              # band 0 reads conv rows < 0
    b_top = max(0, (Lc + pp - Tc + 1 + (Tp * ps) - 1) // (Tp * ps))
    need_top = b_top < nb                          # bands >= b_top read conv rows >= Lc

    # Shifted zero-padded input in bf16: x2 row j == conv-zero-padded-input row (j-pp*s).
    # Band b reads x2 rows [b*step, b*step + Th_a).  Pad + bf16 cast fuse into a single
    # XLA pass (half the extra HBM traffic of the old f32 pad).
    # TODO(synk): fold the halo padding into the kernel (or allow_input_fusion) to drop
    #             this bf16 round trip; add a band-local manual-DMA (pl.ANY) variant for
    #             sequences too long to keep resident in VMEM (esp. 64 MiB v7x).
    left = p + pp * s
    Lx2 = max((nb - 1) * step + Th_a, left + L)
    Lx2 = _round_up(Lx2, 8)
    x2 = jnp.pad(x.astype(jnp.bfloat16), ((0, 0), (left, Lx2 - left - L), (0, 0)))

    packed = (s == 1)
    if packed:
        # (C,1,k,E) -> (E, k*C): one wide RHS fills the 256-wide MXU on v6e/v7x and the
        # LHS band is loaded once instead of k times.
        w_in = jnp.transpose(w[:, 0], (2, 1, 0)).reshape(E, k * C).astype(jnp.bfloat16)
        w_spec = pl.BlockSpec((E, k * C), lambda n, b: (0, 0))
        scratch = [pltpu.VMEM((Th_a, k * C), jnp.float32),
                   pltpu.VMEM((Tc_a, C), jnp.float32)]
    else:
        w_in = jnp.transpose(w[:, 0], (1, 2, 0)).astype(jnp.bfloat16)    # (k, E, C)
        w_spec = pl.BlockSpec((k, E, C), lambda n, b: (0, 0, 0))
        scratch = [pltpu.VMEM((Tc_a, C), jnp.float32)]

    kernel = _make_fused_kernel(packed=packed, k=k, s=s, ps=ps, pk=pk, pp=pp,
                                Tp=Tp, Tc_a=Tc_a, Th_a=Th_a, Lc=Lc, C=C,
                                b_top=b_top, need_low=need_low, need_top=need_top,
                                activation=activation)

    # Explicit VMEM budget: resident bf16 input (double-buffered) + weights + scratches
    # + output tiles, with headroom.  Scoped defaults (16/32 MiB) are too small for
    # long sequences even though physical VMEM is not.
    lane = lambda n: _round_up(n, 128)
    est = (2 * Lx2 * lane(E) * 2                       # x2 block, double-buffered, bf16
           + 2 * _round_up(E, 16) * lane(k * C) * 2    # weights, bf16
           + Th_a * lane(k * C) * 4                    # y scratch (packed path)
           + Tc_a * lane(C) * 4                        # acc scratch
           + 2 * Tp * lane(C) * x.dtype.itemsize)      # output tiles
    vmem_bytes = max(int(1.25 * est) + (2 << 20), 32 << 20)
    try:
        cap = pltpu.get_tpu_info().vmem_capacity_bytes
    except Exception:
        cap = 64 << 20
    vmem_bytes = min(vmem_bytes, int(0.9 * cap))

    out = pl.pallas_call(
        kernel,
        out_shape=jax.ShapeDtypeStruct((N, Lp_pad, C), x.dtype),
        grid_spec=pltpu.PrefetchScalarGridSpec(
            num_scalar_prefetch=0,
            grid=(N, nb),
            in_specs=[
                # full (padded) sequence of one sample; block index ignores the band
                # axis so it is DMA'd once per sample and stays resident across bands.
                pl.BlockSpec((None, Lx2, E), lambda n, b: (n, 0, 0)),
                # full weights, resident for the whole kernel.
                w_spec,
            ],
            out_specs=pl.BlockSpec((None, Tp, C), lambda n, b: (n, b, 0)),
            scratch_shapes=scratch,
        ),
        compiler_params=pltpu.CompilerParams(
            # band axis "arbitrary": keeps the per-sample input block resident (no
            # duplicate fetch under megacore band-sharding); batch axis is parallel.
            dimension_semantics=("parallel", "arbitrary"),
            vmem_limit_bytes=vmem_bytes),
    )(x2, w_in)

    if Lp_pad != Lp:
        out = out[:, :Lp, :]
    return out


# --------------------------------------------------------------------------
# TextTokenizer module (JAX / Pallas)
# --------------------------------------------------------------------------

class TextTokenizerPallas:
    def __init__(self, kernel_size, stride, padding,
                 pooling_kernel_size=3, pooling_stride=2, pooling_padding=1,
                 embedding_dim=300, n_output_channels=128,
                 activation=None, max_pool=True, band_rows=512, key=None):
        self.k, self.s, self.p = kernel_size, stride, padding
        self.pk, self.ps, self.pp = pooling_kernel_size, pooling_stride, pooling_padding
        self.E, self.C = embedding_dim, n_output_channels
        self.max_pool = max_pool
        self.activation = activation            # None -> Identity (PyTorch default)
        self.band_rows = band_rows

        if key is None:
            key = jax.random.PRNGKey(0)
        # kaiming_normal_ on Conv2d weight (C, 1, k, E): std = sqrt(2 / fan_in)
        fan_in = 1 * kernel_size * embedding_dim
        std = (2.0 / fan_in) ** 0.5
        self.weight = jax.random.normal(
            key, (n_output_channels, 1, kernel_size, embedding_dim), jnp.float32) * std

    def seq_len(self, seq_len=32, embed_dim=300):
        Lc = (seq_len + 2 * self.p - self.k) // self.s + 1
        if not self.max_pool:
            return Lc
        return (Lc + 2 * self.pp - self.pk) // self.ps + 1

    def forward_mask(self, mask):
        # Tiny (N, L) boolean bookkeeping -> plain JAX (not worth a kernel).
        m = mask.astype(jnp.float32)
        _, L = m.shape
        k, s, p = self.k, self.s, self.p
        Lc = (L + 2 * p - k) // s + 1
        mp = jnp.pad(m, ((0, 0), (p, p)))
        conv = sum(mp[:, dy:dy + s * (Lc - 1) + 1:s] for dy in range(k))
        out = conv
        if self.max_pool:
            pk, ps, pp = self.pk, self.ps, self.pp
            Lp = (Lc + 2 * pp - pk) // ps + 1
            cp = jnp.pad(conv, ((0, 0), (pp, pp)), constant_values=-jnp.inf)
            out = cp[:, 0:ps * (Lp - 1) + 1:ps]
            for j in range(1, pk):
                out = jnp.maximum(out, cp[:, j:j + ps * (Lp - 1) + 1:ps])
        return out > 0

    def __call__(self, x, mask=None):
        y = text_tokenizer_forward(
            x, self.weight,
            kernel_size=self.k, stride=self.s, padding=self.p,
            pooling_kernel_size=self.pk, pooling_stride=self.ps,
            pooling_padding=self.pp, max_pool=self.max_pool,
            activation=self.activation, band_rows=self.band_rows)
        if mask is not None:
            m = self.forward_mask(mask)[..., None].astype(y.dtype)
            return y * m, m
        return y, None


# --------------------------------------------------------------------------
# Pure-JAX reference (correctness check only)
# --------------------------------------------------------------------------

def reference(x, tok: TextTokenizerPallas):
    y = x[:, None, :, :]                                         # (N,1,L,E)
    y = jax.lax.conv_general_dilated(
        y, tok.weight, (tok.s, 1), [(tok.p, tok.p), (0, 0)],
        dimension_numbers=("NCHW", "OIHW", "NCHW"))              # (N,C,Lc,1)
    if tok.activation is not None:
        y = tok.activation(y)
    if tok.max_pool:
        y = jax.lax.reduce_window(
            y, -jnp.inf, jax.lax.max,
            (1, 1, tok.pk, 1), (1, 1, tok.ps, 1),
            [(0, 0), (0, 0), (tok.pp, tok.pp), (0, 0)])          # (N,C,Lp,1)
    return jnp.transpose(y[:, :, :, 0], (0, 2, 1))               # (N,Lp,C)


if __name__ == "__main__":
    key = jax.random.PRNGKey(0)
    key_x, key_w, key_x2 = jax.random.split(key, 3)

    # ---- Test 1: small shapes, single band (module-default-style config) ----
    N, L, E, C = 2, 16, 32, 128
    x = jax.random.normal(key_x, (N, L, E), jnp.float32)

    tok = TextTokenizerPallas(kernel_size=3, stride=1, padding=1,
                              pooling_kernel_size=3, pooling_stride=2, pooling_padding=1,
                              embedding_dim=E, n_output_channels=C,
                              activation=None, max_pool=True, key=key_w)

    out, out_mask = tok(x)           # mask=None path, like PyTorch forward(x)
    out = jax.block_until_ready(out)

    ref = reference(x, tok)
    assert out.shape == (N, 8, C), out.shape
    assert out_mask is None
    assert tok.seq_len(seq_len=L, embed_dim=E) == out.shape[1]
    # bf16 MXU operands (f32 accumulation) -> loosened tolerance vs f32 reference.
    assert jnp.allclose(out, ref, atol=5e-2, rtol=5e-2), \
        float(jnp.max(jnp.abs(out - ref)))

    # ---- Test 2: longer sequence, several bands (halo + edge masking path) ----
    L2 = 600
    x_long = jax.random.normal(key_x2, (N, L2, E), jnp.float32)
    out2 = text_tokenizer_forward(
        x_long, tok.weight, kernel_size=3, stride=1, padding=1,
        pooling_kernel_size=3, pooling_stride=2, pooling_padding=1,
        max_pool=True, activation=None, band_rows=64)
    out2 = jax.block_until_ready(out2)
    ref2 = reference(x_long, tok)
    assert out2.shape == ref2.shape == (N, 300, C), out2.shape
    assert jnp.allclose(out2, ref2, atol=5e-2, rtol=5e-2), \
        float(jnp.max(jnp.abs(out2 - ref2)))

    print("KERNEL_OK")
</pallas_src>

<mosaic_0001>
module attributes {stable_mosaic.version = 11 : i64} {
  func.func @kernel(%arg0: i32, %arg1: i32, %arg2: memref<1x32x32xbf16, #tpu.memory_space<vmem>>, %arg3: memref<32x384xbf16, #tpu.memory_space<vmem>>, %arg4: memref<1x8x128xf32, #tpu.memory_space<vmem>>, %arg5: memref<32x384xf32, #tpu.memory_space<vmem>>, %arg6: memref<24x128xf32, #tpu.memory_space<vmem>>) attributes {dimension_semantics = [#tpu.dimension_semantics<parallel>, #tpu.dimension_semantics<arbitrary>], iteration_bounds = array<i64: 2, 1>, scalar_prefetch = 0 : i64, scratch_operands = 2 : i64, tpu.core_type = #tpu.core_type<tc>, window_params = [{transform_indices = @transform_0, window_bounds = array<i64: 1, 32, 32>}, {pipeline_mode = #tpu.pipeline_mode<synchronous>, transform_indices = @transform_1, window_bounds = array<i64: 32, 384>}, {transform_indices = @transform_2, window_bounds = array<i64: 1, 8, 128>}]} {
    %c16_i32 = arith.constant 16 : i32
    %0 = arith.muli %arg1, %c16_i32 : i32
    %1 = tpu.assume_multiple %0, 8 : i32
    %c0 = arith.constant 0 : index
    %2 = arith.index_cast %1 : i32 to index
    %c0_0 = arith.constant 0 : index
    %3 = vector.load %arg2[%c0, %2, %c0_0] : memref<1x32x32xbf16, #tpu.memory_space<vmem>>, vector<1x32x32xbf16>
    %4 = vector.shape_cast %3 : vector<1x32x32xbf16> to vector<32x32xbf16>
    %c0_1 = arith.constant 0 : index
    %c0_2 = arith.constant 0 : index
    %5 = vector.load %arg3[%c0_1, %c0_2] : memref<32x384xbf16, #tpu.memory_space<vmem>>, vector<32x384xbf16>
    %cst = arith.constant dense<0.000000e+00> : vector<32x384xf32>
    %6 = tpu.matmul %4, %5, %cst {dimension_numbers = #tpu.dot_dimension_numbers<[1], [0], [0], [1], [0, 0, 1, 1], [], []>} : vector<32x32xbf16>, vector<32x384xbf16>, vector<32x384xf32> -> vector<32x384xf32>
    %c0_3 = arith.constant 0 : index
    %c0_4 = arith.constant 0 : index
    %7 = vector.load %arg5[%c0_3, %c0_4] : memref<32x384xf32, #tpu.memory_space<vmem>>, vector<32x384xf32>
    tpu.vector_store %arg5[%c0_3, %c0_4], %6 {strides = array<i32>} : memref<32x384xf32, #tpu.memory_space<vmem>>, vector<32x384xf32>,
    %c0_5 = arith.constant 0 : index
    %c0_6 = arith.constant 0 : index
    %8 = vector.load %arg5[%c0_5, %c0_6] : memref<32x384xf32, #tpu.memory_space<vmem>>, vector<24x128xf32>
    %c1 = arith.constant 1 : index
    %c128 = arith.constant 128 : index
    %9 = vector.load %arg5[%c1, %c128] : memref<32x384xf32, #tpu.memory_space<vmem>>, vector<24x128xf32>
    %10 = arith.addf %8, %9 : vector<24x128xf32>
    %c2 = arith.constant 2 : index
    %c256 = arith.constant 256 : index
    %11 = vector.load %arg5[%c2, %c256] : memref<32x384xf32, #tpu.memory_space<vmem>>, vector<24x128xf32>
    %12 = arith.addf %10, %11 : vector<24x128xf32>
    %c0_7 = arith.constant 0 : index
    %c0_8 = arith.constant 0 : index
    %13 = vector.load %arg6[%c0_7, %c0_8] : memref<24x128xf32, #tpu.memory_space<vmem>>, vector<24x128xf32>
    tpu.vector_store %arg6[%c0_7, %c0_8], %12 {strides = array<i32>} : memref<24x128xf32, #tpu.memory_space<vmem>>, vector<24x128xf32>,
    %c0_i32 = arith.constant 0 : i32
    %14 = arith.cmpi eq, %arg1, %c0_i32 : i32
    %15 = arith.extui %14 : i1 to i32
    %c0_i32_9 = arith.constant 0 : i32
    %16 = arith.cmpi ne, %15, %c0_i32_9 : i32
    scf.if %16 {
      %c16_i32_19 = arith.constant 16 : i32
      %25 = arith.muli %arg1, %c16_i32_19 : i32
      %c1_i32 = arith.constant 1 : i32
      %26 = arith.subi %25, %c1_i32 : i32
      %27 = tpu.iota {dimensions = array<i32: 0>} : vector<24x1xi32>
      %28 = vector.broadcast %26 : i32 to vector<24x1xi32>
      %29 = arith.addi %27, %28 : vector<24x1xi32>
      %c0_i32_20 = arith.constant 0 : i32
      %30 = vector.broadcast %c0_i32_20 : i32 to vector<24x1xi32>
      %31 = arith.cmpi sge, %29, %30 : vector<24x1xi32>
      %c16_i32_21 = arith.constant 16 : i32
      %32 = vector.broadcast %c16_i32_21 : i32 to vector<24x1xi32>
      %33 = arith.cmpi slt, %29, %32 : vector<24x1xi32>
      %34 = arith.andi %31, %33 : vector<24x1xi1>
      %c0_22 = arith.constant 0 : index
      %c0_23 = arith.constant 0 : index
      %35 = vector.load %arg6[%c0_22, %c0_23] : memref<24x128xf32, #tpu.memory_space<vmem>>, vector<24x128xf32>
      %cst_24 = arith.constant 0xFF800000 : f32
      %36 = vector.shape_cast %34 : vector<24x1xi1> to vector<24x1xi1>
      %37 = vector.broadcast %36 : vector<24x1xi1> to vector<24x128xi1>
      %38 = vector.broadcast %cst_24 : f32 to vector<24x128xf32>
      %39 = arith.select %37, %35, %38 : vector<24x128xi1>, vector<24x128xf32>
      %c0_25 = arith.constant 0 : index
      %c0_26 = arith.constant 0 : index
      %40 = vector.load %arg6[%c0_25, %c0_26] : memref<24x128xf32, #tpu.memory_space<vmem>>, vector<24x128xf32>
      tpu.vector_store %arg6[%c0_25, %c0_26], %39 {strides = array<i32>} : memref<24x128xf32, #tpu.memory_space<vmem>>, vector<24x128xf32>,
    } else {
    }
    %c0_10 = arith.constant 0 : index
    %c0_11 = arith.constant 0 : index
    %17 = tpu.strided_load %arg6[%c0_10, %c0_11] {strides = array<i32: 2, 1>} : memref<24x128xf32, #tpu.memory_space<vmem>>, vector<8x128xf32>
    %c1_12 = arith.constant 1 : index
    %c0_13 = arith.constant 0 : index
    %18 = tpu.strided_load %arg6[%c1_12, %c0_13] {strides = array<i32: 2, 1>} : memref<24x128xf32, #tpu.memory_space<vmem>>, vector<8x128xf32>
    %19 = arith.maximumf %17, %18 : vector<8x128xf32>
    %c2_14 = arith.constant 2 : index
    %c0_15 = arith.constant 0 : index
    %20 = tpu.strided_load %arg6[%c2_14, %c0_15] {strides = array<i32: 2, 1>} : memref<24x128xf32, #tpu.memory_space<vmem>>, vector<8x128xf32>
    %21 = arith.maximumf %19, %20 : vector<8x128xf32>
    %c0_16 = arith.constant 0 : index
    %c0_17 = arith.constant 0 : index
    %c0_18 = arith.constant 0 : index
    %22 = vector.load %arg4[%c0_16, %c0_17, %c0_18] : memref<1x8x128xf32, #tpu.memory_space<vmem>>, vector<1x8x128xf32>
    %23 = vector.shape_cast %22 : vector<1x8x128xf32> to vector<8x128xf32>
    %24 = vector.shape_cast %21 : vector<8x128xf32> to vector<1x8x128xf32>
    tpu.vector_store %arg4[%c0_16, %c0_17, %c0_18], %24 {strides = array<i32>} : memref<1x8x128xf32, #tpu.memory_space<vmem>>, vector<1x8x128xf32>,
    return
  }
  func.func @transform_0(%arg0: i32, %arg1: i32) -> (i32, i32, i32) {
    %c0_i32 = arith.constant 0 : i32
    %c0_i32_0 = arith.constant 0 : i32
    %c0_i32_1 = arith.constant 0 : i32
    return %arg0, %c0_i32, %c0_i32_0 : i32, i32, i32
  }
  func.func @transform_1(%arg0: i32, %arg1: i32) -> (i32, i32) {
    %c0_i32 = arith.constant 0 : i32
    %c0_i32_0 = arith.constant 0 : i32
    %c0_i32_1 = arith.constant 0 : i32
    return %c0_i32, %c0_i32_0 : i32, i32
  }
  func.func @transform_2(%arg0: i32, %arg1: i32) -> (i32, i32, i32) {
    %c0_i32 = arith.constant 0 : i32
    %c0_i32_0 = arith.constant 0 : i32
    return %arg0, %arg1, %c0_i32 : i32, i32, i32
  }
}

</mosaic_0001>

<bundles_post_ra>
// kernel: tpu_custom_call.1
= control target key start
LH: loop header
LB: loop body
LE: loop exit
PB: predicated region body
PF: predicated region fallthrough
CT: control target
= control target key end

     0   :  { %7 = vsyncpa [#allocation5], 0  ;;  %s1099_s0 = inlined_call_operand.hbm [shape: bf16[2,32,32], index: 0, kind: input, shape index: {}]   ;;  %s1100_s1 = inlined_call_operand.hbm [shape: bf16[32,384], index: 1, kind: input, shape index: {}]   ;;  %s1101_s2 = inlined_call_operand.hbm [shape: f32[2,8,128], index: 2, kind: output, shape index: {}]  }
   0x1   :  { %9 = vsyncpa [#allocation5 + $0x1], 0 }
   0x2   :  { %10 = vsyncpa [#allocation8], 0 }
   0x3   :  { %11 = vsyncpa [#allocation6], 0 }
   0x4   :  { %13 = vsyncpa [#allocation6 + $0x1], 0  ;;  %s871_s9 = smov 0   ;;  %s873_s10 = smov 0  }
   0x5   :  { %s875_s11 = smov 0   ;;  %s877_s12 = smov 0  }
   0x6   :  { %s879_s13 = smov 0   ;;  %s881_s14 = smov 0  }
   0x7 LB: > { %s573_s15 = sadd.s32 4294967295, %s846_s14   ;;  %s574_s16 = sadd.s32 4294967294, %s846_s14   ;;  %s846_s14 = sphi %s881_s14, %s19_s14   ;;  %s842_s13 = sphi %s879_s13, %s1125_s13   ;;  %s838_s12 = sphi %s877_s12, %s1124_s12   ;;  %s834_s11 = sphi %s875_s11, %s1123_s11   ;;  %s830_s10 = sphi %s873_s10, %s1122_s10   ;;  %s826_s9 = sphi %s871_s9, %s1121_s9  }
   0x8   : > { %p51_p0 = scmp.ne.s32.totalorder %s830_s10, %s826_s9  ;;  %p905_p1 = scmp.eq.s32.totalorder %s573_s15, 0 }
   0x9   : > { %p909_p2 = scmp.eq.s32.totalorder %s573_s15, 1  ;;  %p104_p3 = scmp.eq.s32.totalorder %s574_s16, 1 }
   0xa   : > { %s1106_s17 = scalar_select %p905_p1, 1, 0 }
   0xb   : > { %s1107_s18 = scalar_select %p909_p2, 1, 0 }
   0xc   : > { %p915_p4 = por %p905_p1, %p51_p0  ;;  %p575_p5 = scmp.ge.s32.totalorder %s846_s14, 1 }
   0xd   : > { %p920_p6 = por %p104_p3, %p51_p0  ;;  %p111_p7 = scmp.lt.s32.totalorder %s846_s14, 3 }
   0xe   : > { %s1108_s19 = scalar_select %p915_p4, 1, 0 }
   0xf   : > { %s1109_s20 = scalar_select %p920_p6, 1, 0 }
  0x10   : > { %p925_p8 = pnand %p575_p5, %p111_p7  ;;  %s848_s22 = smov [#allocation7]  }
  0x11   : > { %s123_s23 = sshll.u32 %s848_s22, 4  ;;  %s31_s25 = sadd.s32 1, %s842_s13  ;;  %s124_s23 = int_to_ptr.vmem [resolvable:$true] %s123_s23 }
  0x12   : > { %s1110_s21 = scalar_select %p925_p8, 1, 0 }
  0x13   : > { %p622_p9 = pneg %p925_p8  ;;  %s702_s28 = scalar_lea.hbm %s1100_s1, 768 }
  0x14   : > { %p703_p12 = scmp.ne.s32.totalorder %s1100_s1, %s702_s28  ;;  %p709_p5 = scmp.lt.u32.totalorder %s702_s28, %s1100_s1 }
  0x15   : > { %p934_p11 = pnand %p622_p9, %p905_p1 }
  0x17   : > { %p704_p13 = pneg %p934_p11 }
  0x19   : > { %p705_p0 = pnand %p704_p13, %p703_p12 }
  0x1b   : > { %p706_p3 = pneg %p705_p0 }
  0x1d   : > { %p711_p7 = pnand %p709_p5, %p706_p3 }
  0x1f   : > { %714 = shalt.err (!%p711_p7)
}
  0x20   : > { %s715_s5 = scalar_lea.vmem %s124_s23, 768  ;;  %p723_p1 = scmp.lt.s32.totalorder %s124_s23, %s124_s23 }
  0x21   : > { %p716_p9 = scmp.ne.s32.totalorder %s124_s23, %s715_s5  ;;  %p724_p4 = scmp.lt.s32.totalorder %s715_s5, %s715_s5 }
  0x23   : > { %p718_p10 = pnand %p716_p9, %p704_p13  ;;  %p725_p8 = por %p724_p4, %p723_p1 }
  0x25   : > { %p719_p6 = pneg %p718_p10 }
  0x27   : > { %p726_p2 = pnand %p725_p8, %p719_p6 }
  0x29   : > { %729 = shalt.err (!%p726_p2)
}
  0x2a   : > { %s849_s6 = smov 192   ;;  %s850_s7 = smov 12  }
  0x2b   : > { %625 = dma.hbm_to_vmem [thread:$0]  (!%p934_p11), %s1100_s1, 768, %s124_s23, [#allocation8], %s849_s6, %s849_s6, %s850_s7  }
  0x2c   : > { %p33_p1 = scmp.ge.s32.totalorder %s31_s25, 2  ;;  %s38_s16 = sadd.s32 1, %s834_s11 }
  0x2d   : > { %p45_p2 = scmp.ne.s32.totalorder %s834_s11, %s830_s10  ;;  %p46_p4 = scmp.eq.s32.totalorder %s846_s14, 0 }
  0x2e   : > { %s1127_s25 = smov (%p33_p1, %s31_s25), 0  ;;  %p1113_p8 = scmp.ne.s32.totalorder %s1107_s18, 0 }
  0x2f   : > { %p961_p6 = por %p46_p4, %p45_p2  ;;  %s35_s24 = ssub.s32 %s842_s13, %s1127_s25 }
  0x30   : > { %p967_p10 = por %p1113_p8, %p45_p2  ;;  %p635_p12 = scmp.lt.s32.totalorder %s846_s14, 2 }
  0x31   : > { %p36_p11 = scmp.eq.s32.totalorder %s35_s24, 0  ;;  %s137_s23 = sand.u32 1, %s834_s11  }
  0x32   : > { %s578_s27 = sshll.u32 %s137_s23, 4  ;;  %s601_s29 = sshll.u32 %s842_s13, 8 }
  0x33   : > { %s976_s28 = scalar_select %p36_p11, %s834_s11, %s38_s16  }
  0x34   : > { %s982_s4 = scalar_lea.hbm %s1099_s0, %s601_s29  ;;  %s141_s18 = scalar_lea.vmem [#allocation4], %s578_s27 }
  0x35   : > { %s148_s5 = sshll.u32 %s141_s18, 4  ;;  %p988_p13 = pnand %p635_p12, %p961_p6  ;;  %s984_s5 = int_to_ptr.vmem [resolvable:$true] %s148_s5 }
  0x36   : > { %s992_s7 = scalar_lea.sflag [#allocation5], %s137_s23  ;;  %s730_s8 = scalar_lea.hbm %s982_s4, 256 }
  0x37   : > { %p731_p0 = scmp.ne.s32.totalorder %s982_s4, %s730_s8  ;;  %p732_p3 = pneg %p988_p13 }
  0x38   : > { %s735_s22 = scalar_lea.hbm %s1099_s0, 512  ;;  %p736_p9 = scmp.lt.u32.totalorder %s982_s4, %s1099_s0 }
  0x39   : > { %p733_p5 = pnand %p732_p3, %p731_p0  ;;  %p737_p1 = scmp.lt.u32.totalorder %s735_s22, %s730_s8 }
  0x3a   : > { %p739_p4 = scmp.lt.u32.totalorder %s730_s8, %s982_s4 }
  0x3b   : > { %p734_p7 = pneg %p733_p5  ;;  %p738_p2 = por %p737_p1, %p736_p9 }
  0x3d   : > { %p740_p6 = por %p739_p4, %p738_p2 }
  0x3f   : > { %p741_p8 = pnand %p740_p6, %p734_p7 }
  0x41   : > { %744 = shalt.err (!%p741_p8)
}
  0x42   : > { %s745_s23 = scalar_lea.vmem %s984_s5, 256  ;;  %s851_s29 = smov [#allocation4]  }
  0x43   : > { %p746_p12 = scmp.ne.s32.totalorder %s984_s5, %s745_s23  ;;  %s750_s30 = sshll.u32 %s851_s29, 4  ;;  %s751_s30 = int_to_ptr.vmem [resolvable:$false] %s750_s30 }
  0x44   : > { %s752_s3 = scalar_lea.vmem %s751_s30, 512  ;;  %p753_p5 = scmp.lt.s32.totalorder %s984_s5, %s751_s30 }
  0x45   : > { %p748_p11 = pnand %p746_p12, %p732_p3  ;;  %p754_p9 = scmp.lt.s32.totalorder %s752_s3, %s745_s23 }
  0x47   : > { %p749_p0 = pneg %p748_p11  ;;  %p755_p1 = por %p754_p9, %p753_p5 }
  0x49   : > { %p756_p2 = pnand %p755_p1, %p749_p0 }
  0x4b   : > { %759 = shalt.err (!%p756_p2)
}
  0x4c   : > { %s852_s18 = smov 64   ;;  %s853_s8 = smov 4  }
  0x4d   : > { %629 = dma.hbm_to_vmem [thread:$0]  (!%p988_p13), %s982_s4, 256, %s984_s5, %s992_s7, %s852_s18, %s852_s18, %s853_s8  }
  0x4e   : > { %p1116_p3 = scmp.ne.s32.totalorder %s1110_s21, 0 }
  0x4f   : > { %s1023_s15 = sand.u32 (!%p1116_p3), 1, %s830_s10   ;;  %p1117_p7 = scmp.ne.s32.totalorder (!%p1116_p3), %s1108_s19, 0 }
  0x50   : > { %160 = sbr.rel (%p1116_p3) target bundleno = 363 (0x16b), region = 28  ;;  %s582_s16 = sshll.u32 (!%p1116_p3), %s1023_s15, 4 }
  0x51   : > { %s163_s22 = scalar_lea.sflag (!%p1116_p3), [#allocation5], %s1023_s15  ;;  %s166_s24 = scalar_lea.vmem (!%p1116_p3), [#allocation4], %s582_s16 }
  0x57   : > { %813 = dma.done.wait (%p1117_p7), %s163_s22, 256  }
  0x58   : > { %815 = vsyncadd (%p1117_p7), %s163_s22, 4294967040  ;;  %p1118_p4 = scmp.ne.s32.totalorder %s1106_s17, 0 }
  0x5a   : > { %817 = dma.done.wait (%p1118_p4), [#allocation8], 768  }
  0x5b   : > { %819 = vsyncadd (%p1118_p4), [#allocation8], 4294966528  ;;  %v854_v0 = vmov 0   ;;  %v692_v1 = vld [vmem:[#allocation7 + $0x4] ss:$12 sps:$4 sm:$0xff]   ;;  %vm251_vm0 = vcmask 261120   ;;  %v427_v13 = vlaneseq }
  0x5c   : > { %290 = vmatprep.mubr.bf16.mxu0 %v854_v0  ;;  %v694_v2 = vld [vmem:[#allocation7] ss:$12 sps:$4 sm:$0xff]   ;;  %258 = vmatprep.subr.bf16.mxu0 %v692_v1  ;;  %v695_v3 = vld [vmem:[#allocation7 + $0x8] ss:$12 sps:$4 sm:$0xff]   ;;  %v698_v5 = vld [vmem:[#allocation7 + $0x18] ss:$12 sps:$4 sm:$0xff]  }
  0x5d   : > { %259 = vmatpush1.bf16.msra.mxu0 %v694_v2  ;;  %v696_v4 = vld [vmem:[#allocation7 + $0x1c] ss:$12 sps:$4 sm:$0xff]   ;;  %606 = vmatprep.subr.bf16.mxu1 %v695_v3  ;;  %v699_v6 = vld [vmem:[#allocation7 + $0x20] ss:$12 sps:$4 sm:$0xff]   ;;  %vm405_vm1 = vcmask 1045504   ;;  %v428_v20 = vshrl.u32 %v427_v13, 7 }
  0x5e   : > { %607 = vmatpush3.bf16.msra.mxu1 %v695_v3  ;;  %260 = vmatprep.subr.bf16.mxu0 %v696_v4  ;;  %v700_v7 = vld [vmem:[%s166_s24] sm:$0xff]   ;;  %v701_v8 = vld [vmem:[%s166_s24 + $0x8] sm:$0xff]   ;;  %vm383_vm2 = vcmask 1046528   ;;  %s584_s17 = sshll.u32 %s1023_s15, 3  ;;  %s598_s19 = sshll.u32 %s838_s12, 7 }
  0x5f   : > { %608 = vmatprep.subr.bf16.mxu1 %v699_v6  ;;  %610 = vmatprep.mubr.msk.bf16.mxu1 %vm251_vm0, %v700_v7  ;;  %v432_v29 = vadd.s32 4294967295, %v428_v20  ;;  %v430_v40 = vadd.s32 16, %v428_v20  ;;  %s190_s21 = scalar_lea.vmem [#allocation9], %s584_s17  ;;  %s1050_s7 = scalar_lea.hbm %s1101_s2, %s598_s19 }
  0x60   : > { %s482_s4 = sshll.u32 %s190_s21, 4  ;;  %s468_s27 = scalar_lea.sflag [#allocation6], %s1023_s15  ;;  %s1052_s4 = int_to_ptr.vmem [resolvable:$true] %s482_s4 }
  0x61   : > { %261 = vmatpush1.bf16.msra.mxu0 %v698_v5  ;;  %vm435_vm3 = vcmp.ge.s32.totalorder %v432_v29, 0  ;;  %v434_v46 = vadd.s32 4294967295, %v430_v40  ;;  %s760_s23 = scalar_lea.vmem %s1052_s4, 128  ;;  %s855_s12 = smov [#allocation9]  }
  0x62   : > { %609 = vmatpush3.bf16.msra.mxu1 %v699_v6  ;;  %p761_p13 = scmp.ne.s32.totalorder %s1052_s4, %s760_s23  ;;  %s764_s29 = sshll.u32 %s855_s12, 4  ;;  %s765_s29 = int_to_ptr.vmem [resolvable:$false] %s764_s29 }
  0x63   : > { %vm440_vm4 = vcmp.lt.s32.totalorder %v434_v46, 16  ;;  %s766_s30 = scalar_lea.vmem %s765_s29, 256  ;;  %p767_p12 = scmp.lt.s32.totalorder %s1052_s4, %s765_s29 }
  0x64   : > { %593 = vmatmul.mubr.msk.bf16.vlgmr.msra.gmra.mrb[0].mxu0 %vm251_vm0, %v700_v7  ;;  %p762_p6 = pnand %p761_p13, %p967_p10  ;;  %p768_p11 = scmp.lt.s32.totalorder %s766_s30, %s760_s23 }
  0x65   : > { %300 = vmatprep.mubr.bf16.mxu0 %v854_v0  ;;  %611 = vmatmul.mubr.msk.bf16.vlgmr.msra.gmra.mrb[0].mxu1 %vm251_vm0, %v701_v8 }
  0x66   : > { %p763_p8 = pneg %p762_p6  ;;  %p769_p0 = por %p768_p11, %p767_p12 }
  0x68   : > { %p770_p5 = pnand %p769_p0, %p763_p8 }
  0x6c   : > { %594 = vmatmul.mubr.msk.bf16.gmra.mrb[4].mxu0 %vm251_vm0, %v701_v8 }
 0x137   : > { %v292_v9 = vpop.f32.mrb[0].mxu0 }
 0x138   : > { %v294_v10 = vpop.f32.mrb[1].mxu0  ;;  %v612_v12 = vpop.f32.mrb[0].mxu1 }
 0x139   : > { %361 = vst [vmem:[#allocation2 + $0x8] sm:$0xff] %v294_v10  ;;  %v296_v11 = vpop.f32.mrb[2].mxu0  ;;  %v345_v15 = vpop.f32.mrb[1].mxu1  ;;  %v409_v16 = vrot.slane %v612_v12, 2 }
 0x13a   : > { %v298_v14 = vpop.f32.mrb[3].mxu0  ;;  %362 = vst [vmem:[#allocation2 + $0x10] sm:$0xff] %v345_v15  ;;  %v613_v17 = vpop.f32.mrb[2].mxu1 }
 0x13b   : > { %371 = vst [vmem:[#allocation2 + $0x58] sm:$0xff] %v613_v17  ;;  %v348_v18 = vpop.f32.mrb[3].mxu1  ;;  %v385_v26 = vrot.slane %v298_v14, 1 }
 0x13c   : > { %v407_v19 = vrot.slane %v348_v18, 2 }
 0x13e   : > { %v410_v21 = vsel %vm405_vm1, %v407_v19, %v409_v16 }
 0x13f   : > { %v302_v22 = vpop.f32.mrb[4].mxu0 }
 0x140   : > { %v375_v23 = vld [vmem:[#allocation2 + $0x8] sm:$0xfe]  ;;  %v304_v24 = vpop.f32.mrb[5].mxu0 }
 0x141   : > { %v384_v25 = vrot.slane %v375_v23, 1  ;;  %v387_v27 = vrot.slane %v304_v24, 1  ;;  %v306_v28 = vpop.f32.mrb[6].mxu0  ;;  %v397_v30 = vld [vmem:[#allocation2 + $0x10] sm:$0xfc] }
 0x142   : > { %v308_v31 = vpop.f32.mrb[7].mxu0  ;;  %v406_v33 = vrot.slane %v397_v30, 2  ;;  %v400_v41 = vld [vmem:[#allocation2 + $0x58] sm:$0x3] }
 0x143   : > { %v386_v32 = vsel %vm383_vm2, %v384_v25, %v385_v26  ;;  %v388_v34 = vsel %vm383_vm2, %v385_v26, %v387_v27  ;;  %370 = vst [vmem:[#allocation2 + $0x50] sm:$0xff] %v308_v31  ;;  %v411_v44 = vrot.slane %v400_v41, 2 }
 0x144   : > { %v394_v35 = vadd.f32 %v386_v32, %v292_v9  ;;  %v395_v36 = vadd.f32 %v388_v34, %v296_v11  ;;  %v408_v37 = vsel %vm405_vm1, %v406_v33, %v407_v19 }
 0x145   : > { %v412_v49 = vsel %vm405_vm1, %v409_v16, %v411_v44 }
 0x146   : > { %v416_v38 = vadd.f32 %v408_v37, %v394_v35  ;;  %v417_v39 = vadd.f32 %v410_v21, %v395_v36 }
 0x148   : > { %v453_v42 = vsel %vm435_vm3, %v416_v38, -inf  ;;  %457 = vst [vmem:[#allocation3 + $0x8] sm:$0xff] %v417_v39 }
 0x149   : > { %456 = vst [vmem:[#allocation3] sm:$0xff] %v453_v42 }
 0x14a   : > { %v378_v43 = vld [vmem:[#allocation2 + $0x50] sm:$0x1] }
 0x14b   : > { %v389_v45 = vrot.slane %v378_v43, 1 }
 0x14d   : > { %v390_v47 = vsel %vm383_vm2, %v387_v27, %v389_v45 }
 0x14e   : > { %v396_v48 = vadd.f32 %v390_v47, %v302_v22 }
 0x150   : > { %v418_v50 = vadd.f32 %v412_v49, %v396_v48  ;;  %v459_v52 = vld [vmem:[#allocation3] ss:$2 sm:$0xff]  ;;  %v461_v53 = vld [vmem:[#allocation3 + $0x1] ss:$2 sm:$0xff] }
 0x151   : > { %v462_v54 = vmax.f32 %v459_v52, %v461_v53 }
 0x152   : > { %v455_v51 = vsel %vm440_vm4, %v418_v50, -inf }
 0x153   : > { %458 = vst [vmem:[#allocation3 + $0x10] sm:$0xff] %v455_v51 }
 0x15a   : > { %v464_v55 = vld [vmem:[#allocation3 + $0x2] ss:$2 sm:$0xff] }
 0x15b   : > { %v465_v56 = vmax.f32 %v462_v54, %v464_v55 }
 0x15d   : > { %466 = vst [vmem:[%s190_s21] sm:$0xff] %v465_v56 }
 0x15e   : > { %773 = shalt.err (!%p770_p5)
}
 0x15f   : > { %s774_s3 = scalar_lea.hbm %s1050_s7, 128  ;;  %s778_s15 = scalar_lea.hbm %s1101_s2, 256 }
 0x160   : > { %p775_p9 = scmp.ne.s32.totalorder %s1050_s7, %s774_s3  ;;  %p779_p3 = scmp.lt.u32.totalorder %s1050_s7, %s1101_s2 }
 0x161   : > { %p780_p7 = scmp.lt.u32.totalorder %s778_s15, %s774_s3  ;;  %p782_p13 = scmp.lt.u32.totalorder %s774_s3, %s1050_s7 }
 0x162   : > { %p776_p1 = pnand %p775_p9, %p967_p10 }
 0x163   : > { %p781_p4 = por %p780_p7, %p779_p3 }
 0x164   : > { %p777_p2 = pneg %p776_p1 }
 0x165   : > { %p783_p6 = por %p782_p13, %p781_p4 }
 0x167   : > { %p784_p8 = pnand %p783_p6, %p777_p2 }
 0x169   : > { %787 = shalt.err (!%p784_p8)
}
 0x16a   : > { %620 = dma.vmem_to_hbm [thread:$0]  (%p967_p10), %s1052_s4, 128, %s1050_s7, %s468_s27  }
 0x16b PF: > { %s494_s24 = sand.u32 1, %s826_s9   ;;  %p1119_p12 = scmp.ne.s32.totalorder %s1109_s20, 0 }
 0x16c   : > { %p1120_p11 = scmp.ge.s32.totalorder %s846_s14, 2  ;;  %s495_s17 = scalar_lea.sflag [#allocation6], %s494_s24 }
 0x16e   : > { %p631_p0 = pnand %p1120_p11, %p1119_p12 }
 0x170   : > { %821 = dma.done.wait (!%p631_p0), %s495_s17, 128  }
 0x171   : > { %823 = vsyncadd (!%p631_p0), %s495_s17, 4294967168  ;;  %s19_s14 = sadd.s32 1, %s846_s14   ;;  %s1121_s9 = smov %s830_s10 }
 0x172   : > { %p16_p5 = scmp.ge.s32.totalorder %s19_s14, 4   ;;  %s1122_s10 = smov %s834_s11 }
 0x173   : > { %s1123_s11 = smov %s976_s28  ;;  %s1124_s12 = smov %s842_s13 }
 0x174   : > { %s1125_s13 = smov %s1127_s25  ;;  %18 = sbr.rel (!%p16_p5) target bundleno = 7 (0x7), region = 84 }
 0x17b   :  { %500 = vsyncpa [#allocation5], 1 }
 0x17c   :  { %502 = vsyncpa [#allocation5 + $0x1], 1 }
 0x17d   :  { %503 = vsyncpa [#allocation8], 1 }
 0x17e   :  { %504 = vsyncpa [#allocation6], 1 }
 0x17f   :  { %506 = vsyncpa [#allocation6 + $0x1], 1 }

</bundles_post_ra>
